<compile_context>
chip_gen: v6e
topology: v6e:2x2x1
jax: 0.10.0
libtpu: 0.0.40
codegen_flags: <defaults>
</compile_context>

<pallas_src>
import jax
import jax.numpy as jnp
from jax.experimental import pallas as pl
from jax.experimental.pallas import tpu as pltpu


_PAD = 256  # N/K padding multiple: keeps v7x's 256x256 MXU tiles full, (8,128)-friendly.


def _round_up(x: int, m: int) -> int:
    return ((x + m - 1) // m) * m


def _cdiv(a: int, b: int) -> int:
    return (a + b - 1) // b


# ---------------------------------------------------------------------------
# Kernels
# ---------------------------------------------------------------------------

def _qcp_kernel_single_k(scale_ref, x_ref, w_ref, bias_ref, o_ref):
    """K fits in one tile: no accumulator scratch, no k-predication."""
    # direct_cast_dequantize: int8 -> bf16 is exact (|w| <= 127).
    # TODO(synk): on v5e/v6e the MXU accepts i8 operands directly; the explicit bf16
    # cast is kept for portability (v7x MXU has no integer path).
    w = w_ref[...].astype(jnp.bfloat16)                     # (Kp, tn), lane-dense N
    acc = jnp.dot(x_ref[...], w, preferred_element_type=jnp.float32)
    # scale_dequantize (per-tensor symmetric) + bias, applied exactly once.
    acc = acc * scale_ref[0, 0] + bias_ref[...].astype(jnp.float32)
    o_ref[...] = acc.astype(o_ref.dtype)


def _qcp_kernel_multi_k(scale_ref, x_ref, w_ref, bias_ref, o_ref, acc_ref):
    """K split across grid axis 2; f32 VMEM accumulator, epilogue on last k step."""
    k = pl.program_id(2)

    @pl.when(k == 0)
    def _():
        acc_ref[...] = jnp.zeros_like(acc_ref)

    w = w_ref[...].astype(jnp.bfloat16)                     # (tk, tn)
    acc_ref[...] += jnp.dot(x_ref[...], w, preferred_element_type=jnp.float32)

    @pl.when(k == pl.num_programs(2) - 1)
    def _():
        acc = acc_ref[...] * scale_ref[0, 0] + bias_ref[...].astype(jnp.float32)
        o_ref[...] = acc.astype(o_ref.dtype)


# ---------------------------------------------------------------------------
# One-time weight layout plumbing (hoisted out of the per-call forward path)
# ---------------------------------------------------------------------------

def prepare_qcp_weight(weight_q):
    """(N, K) int8 checkpoint weight -> K-major, 256-padded (Kp, Np) int8.

    Run once at load time (or cache the result); keeps the per-call forward free of
    the full-weight transpose+pad copy.
    """
    N, K = weight_q.shape
    Kp, Np = _round_up(K, _PAD), _round_up(N, _PAD)
    wT = weight_q.T                                         # (K, N) int8, K-major
    if (Kp, Np) != (K, N):
        wT = jnp.pad(wT, ((0, Kp - K), (0, Np - N)))
    return wT


# ---------------------------------------------------------------------------
# Forward
# ---------------------------------------------------------------------------

def quantized_column_parallel_forward(x, wT_prepared, scale, bias, *,
                                      tm=None, tn=None, tk=None):
    """x: (B, S, K) float; wT_prepared: (Kp, Np) int8 from prepare_qcp_weight;
    scale: shape-(1,) per-tensor scale; bias: (N,) in dequantized dtype."""
    B, S, K = x.shape
    Kp, Np = wT_prepared.shape
    N = bias.shape[0]
    assert Kp == _round_up(K, _PAD) and Np >= N
    M = B * S
    out_dtype = x.dtype

    # ---- tile selection ----------------------------------------------------
    # M: multiples of 16 (bf16 sublane packing); pick tm that minimizes M-pad waste.
    M16 = _round_up(M, 16)
    if tm is None:
        tm_cap = 1024 if M16 >= 2048 else 512      # large-M: reuse the int8 weight more
        n_m = _cdiv(M16, tm_cap)
        tm = _round_up(_cdiv(M16, n_m), 16)
    Mp = _round_up(M16, tm)
    n_m_tiles = Mp // tm

    # N: lane-dense multiples of 256; when there is a single M tile prefer >= 2 N tiles
    # so v7x's two TensorCores both get work (negligible cost on 1-TC chips).
    if tn is None:
        cands = [c for c in (1024, 768, 512, 256) if Np % c == 0]
        want_two = (n_m_tiles == 1) and Np >= 512
        tn = next((c for c in cands if (not want_two) or (Np // c >= 2)), cands[-1])

    # K: single tile when it fits (2-D grid, no scratch accumulator); else ~1024.
    if tk is None:
        if Kp <= 2048:
            tk = Kp
        else:
            tk = next(c for c in (1024, 768, 512, 256) if Kp % c == 0)
    multi_k = (tk != Kp)

    # ---- operand prep (cheap / skipped when aligned) -------------------------
    # bf16 activations: halves activation HBM traffic (x is re-streamed once per N tile).
    x2d = x.reshape(M, K).astype(jnp.bfloat16)
    if (Mp, Kp) != (M, K):
        x2d = jnp.pad(x2d, ((0, Mp - M), (0, Kp - K)))

    bias2d = bias.reshape(1, N).astype(jnp.float32)
    if Np != N:
        bias2d = jnp.pad(bias2d, ((0, 0), (0, Np - N)))

    scale2d = jnp.asarray(scale, dtype=jnp.float32).reshape(1, 1)

    # ---- VMEM budget ---------------------------------------------------------
    out_bytes = jnp.dtype(out_dtype).itemsize
    need = (2 * tm * tk * 2            # bf16 activations, double-buffered
            + 2 * tk * tn * 1          # int8 weight, double-buffered
            + 2 * tm * tn * out_bytes  # output tile, double-buffered
            + 2 * tn * 4)              # bias tile
    if multi_k:
        need += tm * tn * 4            # f32 accumulator scratch
    vmem_limit = int(min(max(2 * need, 32 * 1024 * 1024), 48 * 1024 * 1024))

    # ---- pallas_call ---------------------------------------------------------
    if not multi_k:
        grid = (n_m_tiles, Np // tn)
        out2d = pl.pallas_call(
            _qcp_kernel_single_k,
            out_shape=jax.ShapeDtypeStruct((Mp, Np), out_dtype),
            grid_spec=pltpu.PrefetchScalarGridSpec(
                num_scalar_prefetch=0,
                grid=grid,
                in_specs=[
                    pl.BlockSpec((1, 1), lambda i, j: (0, 0),
                                 memory_space=pltpu.MemorySpace.SMEM),   # per-tensor scale
                    pl.BlockSpec((tm, Kp), lambda i, j: (i, 0)),         # bf16 activations
                    pl.BlockSpec((Kp, tn), lambda i, j: (0, j)),         # int8 weight, K-major
                    pl.BlockSpec((1, tn), lambda i, j: (0, j)),          # bias tile
                ],
                out_specs=pl.BlockSpec((tm, tn), lambda i, j: (i, j)),
            ),
            compiler_params=pltpu.CompilerParams(
                dimension_semantics=("parallel", "parallel"),
                vmem_limit_bytes=vmem_limit,
            ),
        )(scale2d, x2d, wT_prepared, bias2d)
    else:
        grid = (n_m_tiles, Np // tn, Kp // tk)
        out2d = pl.pallas_call(
            _qcp_kernel_multi_k,
            out_shape=jax.ShapeDtypeStruct((Mp, Np), out_dtype),
            grid_spec=pltpu.PrefetchScalarGridSpec(
                num_scalar_prefetch=0,
                grid=grid,
                in_specs=[
                    pl.BlockSpec((1, 1), lambda i, j, k: (0, 0),
                                 memory_space=pltpu.MemorySpace.SMEM),   # per-tensor scale
                    pl.BlockSpec((tm, tk), lambda i, j, k: (i, k)),      # bf16 activations
                    pl.BlockSpec((tk, tn), lambda i, j, k: (k, j)),      # int8 weight, K-major
                    pl.BlockSpec((1, tn), lambda i, j, k: (0, j)),       # bias tile
                ],
                out_specs=pl.BlockSpec((tm, tn), lambda i, j, k: (i, j)),
                scratch_shapes=[pltpu.VMEM((tm, tn), jnp.float32)],      # f32 accumulator
            ),
            compiler_params=pltpu.CompilerParams(
                dimension_semantics=("parallel", "parallel", "arbitrary"),
                vmem_limit_bytes=vmem_limit,
            ),
        )(scale2d, x2d, wT_prepared, bias2d)

    return out2d[:M, :N].reshape(B, S, N)


if __name__ == "__main__":
    # Module config: input_size=128, output_size=256, bias=True, per_tensor_symmetric,
    # world_size=1 -> output_size_per_partition == output_size, dtype=float32, int8 weights.
    B, S, K, N = 2, 8, 128, 256

    key = jax.random.PRNGKey(0)
    kx, kw, kb = jax.random.split(key, 3)

    x = jax.random.normal(kx, (B, S, K), dtype=jnp.float32)
    # Deterministic synthetic quantized weight (module inits to zeros; random int8 so the
    # matmul is non-trivial). Shape = (output_size_per_partition, input_size) = (N, K).
    weight_q = jax.random.randint(kw, (N, K), minval=-127, maxval=128,
                                  dtype=jnp.int32).astype(jnp.int8)
    bias = jax.random.normal(kb, (N,), dtype=jnp.float32)
    scale = jnp.array([0.02], dtype=jnp.float32)   # per-tensor symmetric scale, shape (1,)

    # One-time, load-time weight layout plumbing (hoisted out of the forward path).
    wT = jax.block_until_ready(prepare_qcp_weight(weight_q))

    out = quantized_column_parallel_forward(x, wT, scale, bias)
    out = jax.block_until_ready(out)

    # Pure-JAX f32 reference (direct-cast dequant -> matmul -> scale -> bias).
    # The kernel runs the MXU with bf16 operands (int8->bf16 exact, activations rounded),
    # so compare with a correspondingly loose tolerance.
    ref = (x.reshape(B * S, K) @ weight_q.astype(jnp.float32).T) * scale[0] + bias
    ref = ref.reshape(B, S, N)
    assert out.shape == (B, S, N) and out.dtype == jnp.float32
    assert jnp.allclose(out, ref, rtol=2e-2, atol=0.3), "mismatch vs reference"

    # TODO(synk): tensor-parallel collectives (copy_to_tensor_model_parallel_region /
    # gather_from_tensor_model_parallel_region) are identity at world_size=1 and omitted.
    print("KERNEL_OK")
</pallas_src>

<mosaic_0001>
module attributes {stable_mosaic.version = 11 : i64} {
  func.func @_qcp_kernel_single_k(%arg0: i32, %arg1: i32, %arg2: memref<1x1xf32, #tpu.memory_space<smem>>, %arg3: memref<16x256xbf16, #tpu.memory_space<vmem>>, %arg4: memref<256x256xi8, #tpu.memory_space<vmem>>, %arg5: memref<1x256xf32, #tpu.memory_space<vmem>>, %arg6: memref<16x256xf32, #tpu.memory_space<vmem>>) attributes {dimension_semantics = [#tpu.dimension_semantics<parallel>, #tpu.dimension_semantics<parallel>], iteration_bounds = array<i64: 1, 1>, scalar_prefetch = 0 : i64, scratch_operands = 0 : i64, tpu.core_type = #tpu.core_type<tc>, window_params = [{transform_indices = @transform_0, window_bounds = array<i64: 1, 1>}, {transform_indices = @transform_1, window_bounds = array<i64: 16, 256>}, {transform_indices = @transform_2, window_bounds = array<i64: 256, 256>}, {transform_indices = @transform_3, window_bounds = array<i64: 1, 256>}, {transform_indices = @transform_4, window_bounds = array<i64: 16, 256>}]} {
    %c0 = arith.constant 0 : index
    %c0_0 = arith.constant 0 : index
    %0 = vector.load %arg4[%c0, %c0_0] : memref<256x256xi8, #tpu.memory_space<vmem>>, vector<256x256xi8>
    %1 = arith.sitofp %0 : vector<256x256xi8> to vector<256x256xbf16>
    %c0_1 = arith.constant 0 : index
    %c0_2 = arith.constant 0 : index
    %2 = vector.load %arg3[%c0_1, %c0_2] : memref<16x256xbf16, #tpu.memory_space<vmem>>, vector<16x256xbf16>
    %cst = arith.constant dense<0.000000e+00> : vector<16x256xf32>
    %3 = tpu.matmul %2, %1, %cst {dimension_numbers = #tpu.dot_dimension_numbers<[1], [0], [0], [1], [0, 0, 1, 1], [], []>} : vector<16x256xbf16>, vector<256x256xbf16>, vector<16x256xf32> -> vector<16x256xf32>
    %c0_3 = arith.constant 0 : index
    %c0_4 = arith.constant 0 : index
    %4 = memref.load %arg2[%c0_3, %c0_4] : memref<1x1xf32, #tpu.memory_space<smem>>
    %5 = vector.broadcast %4 : f32 to vector<16x256xf32>
    %6 = arith.mulf %3, %5 : vector<16x256xf32>
    %c0_5 = arith.constant 0 : index
    %c0_6 = arith.constant 0 : index
    %7 = vector.load %arg5[%c0_5, %c0_6] : memref<1x256xf32, #tpu.memory_space<vmem>>, vector<1x256xf32>
    %8 = vector.broadcast %7 : vector<1x256xf32> to vector<16x256xf32>
    %9 = arith.addf %6, %8 : vector<16x256xf32>
    %c0_7 = arith.constant 0 : index
    %c0_8 = arith.constant 0 : index
    %10 = vector.load %arg6[%c0_7, %c0_8] : memref<16x256xf32, #tpu.memory_space<vmem>>, vector<16x256xf32>
    tpu.vector_store %arg6[%c0_7, %c0_8], %9 {strides = array<i32>} : memref<16x256xf32, #tpu.memory_space<vmem>>, vector<16x256xf32>,
    return
  }
  func.func @transform_0(%arg0: i32, %arg1: i32) -> (i32, i32) {
    %c0_i32 = arith.constant 0 : i32
    %c0_i32_0 = arith.constant 0 : i32
    %c0_i32_1 = arith.constant 0 : i32
    return %c0_i32, %c0_i32_0 : i32, i32
  }
  func.func @transform_1(%arg0: i32, %arg1: i32) -> (i32, i32) {
    %c0_i32 = arith.constant 0 : i32
    %c0_i32_0 = arith.constant 0 : i32
    return %arg0, %c0_i32 : i32, i32
  }
  func.func @transform_2(%arg0: i32, %arg1: i32) -> (i32, i32) {
    %c0_i32 = arith.constant 0 : i32
    %c0_i32_0 = arith.constant 0 : i32
    return %c0_i32, %arg1 : i32, i32
  }
  func.func @transform_3(%arg0: i32, %arg1: i32) -> (i32, i32) {
    %c0_i32 = arith.constant 0 : i32
    %c0_i32_0 = arith.constant 0 : i32
    return %c0_i32, %arg1 : i32, i32
  }
  func.func @transform_4(%arg0: i32, %arg1: i32) -> (i32, i32) {
    %c0_i32 = arith.constant 0 : i32
    return %arg0, %arg1 : i32, i32
  }
}

</mosaic_0001>

<bundles_post_ra>
// kernel: tpu_custom_call.1
= control target key start
LH: loop header
LB: loop body
LE: loop exit
PB: predicated region body
PF: predicated region fallthrough
CT: control target
= control target key end

     0   :  { %10 = vsyncpa [#allocation4], 0  ;;  %s325_s0 = inlined_call_operand.<no memory space> [shape: f32[1,1], index: 0, kind: input, shape index: {}]   ;;  %s326_s1 = inlined_call_operand.hbm [shape: bf16[16,256], index: 1, kind: input, shape index: {}]   ;;  %s327_s2 = inlined_call_operand.hbm [shape: s8[256,256], index: 2, kind: input, shape index: {}]   ;;  %s328_s3 = inlined_call_operand.vmem [shape: f32[1,256], index: 3, kind: input, shape index: {}]   ;;  %s329_s4 = inlined_call_operand.hbm [shape: f32[16,256], index: 4, kind: output, shape index: {}]  }
   0x1   :  { %11 = vsyncpa [#allocation7], 0 }
   0x2   :  { %12 = vsyncpa [#allocation5], 0  ;;  %s272_s15 = smov [#allocation3]  }
   0x3   :  { %s20_s16 = sshll.u32 %s272_s15, 4  ;;  %s21_s16 = int_to_ptr.vmem [resolvable:$true] %s20_s16 }
   0x4   :  { %s214_s17 = scalar_lea.vmem %s21_s16, 256  ;;  %p219_p1 = scmp.lt.s32.totalorder %s21_s16, %s21_s16 }
   0x5   :  { %p215_p0 = scmp.ne.s32.totalorder %s21_s16, %s214_s17  ;;  %p220_p2 = scmp.lt.s32.totalorder %s214_s17, %s214_s17 }
   0x7   :  { %p221_p3 = por %p220_p2, %p219_p1 }
   0x9   :  { %p222_p4 = pnand %p221_p3, %p215_p0 }
   0xb   :  { %225 = shalt.err (!%p222_p4)
}
   0xc   :  { %s273_s18 = smov 128   ;;  %s274_s19 = smov 8  }
   0xd   :  { %26 = dma.hbm_to_vmem [thread:$0]  %s326_s1, 256, %s21_s16, [#allocation4], %s273_s18, %s273_s18, %s274_s19  }
   0xe   :  { %s275_s22 = smov [#allocation6]  }
   0xf   :  { %s32_s23 = sshll.u32 %s275_s22, 4  ;;  %s33_s23 = int_to_ptr.vmem [resolvable:$true] %s32_s23 }
  0x10   :  { %s234_s24 = scalar_lea.vmem %s33_s23, 2048  ;;  %p239_p6 = scmp.lt.s32.totalorder %s33_s23, %s33_s23 }
  0x11   :  { %p235_p5 = scmp.ne.s32.totalorder %s33_s23, %s234_s24  ;;  %p240_p7 = scmp.lt.s32.totalorder %s234_s24, %s234_s24 }
  0x13   :  { %p241_p8 = por %p240_p7, %p239_p6 }
  0x15   :  { %p242_p9 = pnand %p241_p8, %p235_p5 }
  0x17   :  { %245 = shalt.err (!%p242_p9)
}
  0x18   :  { %s276_s25 = smov 256   ;;  %s277_s26 = smov 16  }
  0x19   :  { %38 = dma.hbm_to_vmem [thread:$0]  %s327_s2, 2048, %s33_s23, [#allocation7], %s276_s25, %s276_s25, %s277_s26  }
  0x1a   :  { %266 = dma.done.wait [#allocation4], 256  }
  0x1b   :  { %267 = vsyncadd [#allocation4], 4294967040 }
  0x1c   :  { %268 = dma.done.wait [#allocation7], 2048  }
  0x1d   :  { %269 = vsyncadd [#allocation7], 4294965248  ;;  %v54_v0 = vld [vmem:[#allocation6 + $0x38] sm:$0xff]  ;;  %v53_v1 = vld [vmem:[#allocation6 + $0x30] sm:$0xff]  ;;  %v158_v50 = vlaneseq  ;;  %v151_v55 = vstv %s325_s0  ;;  %s278_s5 = smov [#allocation8]  }
  0x1e   :  { %v76_v2 = vunpack.c.l.s8.bf16 %v54_v0  ;;  %v78_v3 = vunpack.c.h.s8.bf16 %v54_v0  ;;  %v77_v4 = vunpack.c.h.s8.bf16 %v53_v1  ;;  %v52_v5 = vld [vmem:[#allocation6 + $0x28] sm:$0xff]  ;;  %v75_v6 = vunpack.c.l.s8.bf16 %v53_v1  ;;  %v51_v8 = vld [vmem:[#allocation6 + $0x20] sm:$0xff]  ;;  %v205_v9 = vld [vmem:[#allocation3 + $0x4] ss:$8 sps:$4 sm:$0xff]   ;;  %s181_s6 = sshll.u32 %s278_s5, 4  ;;  %s182_s6 = int_to_ptr.vmem [resolvable:$true] %s181_s6 }
  0x1f   :  { %v74_v7 = vunpack.c.h.s8.bf16 %v52_v5  ;;  %v73_v10 = vunpack.c.h.s8.bf16 %v51_v8  ;;  %139 = vmatprep.mubr.bf16.mxu0 %v205_v9  ;;  %v72_v11 = vunpack.c.l.s8.bf16 %v52_v5  ;;  %v50_v12 = vld [vmem:[#allocation6 + $0x18] sm:$0xff]  ;;  %v71_v13 = vunpack.c.l.s8.bf16 %v51_v8  ;;  %v49_v15 = vld [vmem:[#allocation6 + $0x10] sm:$0xff]  ;;  %v48_v18 = vld [vmem:[#allocation6 + $0x8] sm:$0xff]  ;;  %s246_s0 = scalar_lea.vmem %s182_s6, 512  ;;  %p251_p11 = scmp.lt.s32.totalorder %s182_s6, %s182_s6 }
  0x20   :  { %107 = vmatprep.subr.bf16.mxu0 %v78_v3  ;;  %v70_v14 = vunpack.c.h.s8.bf16 %v50_v12  ;;  %v69_v16 = vunpack.c.h.s8.bf16 %v49_v15  ;;  %v68_v17 = vunpack.c.l.s8.bf16 %v50_v12  ;;  %v67_v19 = vunpack.c.l.s8.bf16 %v49_v15  ;;  %v47_v21 = vld [vmem:[#allocation6] sm:$0xff]  ;;  %v62_v24 = vld [vmem:[#allocation6 + $0x78] sm:$0xff]  ;;  %v61_v27 = vld [vmem:[#allocation6 + $0x70] sm:$0xff]  ;;  %p247_p10 = scmp.ne.s32.totalorder %s182_s6, %s246_s0  ;;  %p252_p12 = scmp.lt.s32.totalorder %s246_s0, %s246_s0 }
  0x21   :  { %108 = vmatpush1.bf16.msra.mxu0 %v77_v4  ;;  %v66_v20 = vunpack.c.h.s8.bf16 %v48_v18  ;;  %v65_v22 = vunpack.c.h.s8.bf16 %v47_v21  ;;  %v64_v23 = vunpack.c.l.s8.bf16 %v48_v18  ;;  %v63_v25 = vunpack.c.l.s8.bf16 %v47_v21  ;;  %v60_v30 = vld [vmem:[#allocation6 + $0x68] sm:$0xff]  ;;  %v59_v33 = vld [vmem:[#allocation6 + $0x60] sm:$0xff]  ;;  %v58_v36 = vld [vmem:[#allocation6 + $0x58] sm:$0xff] }
  0x22   :  { %109 = vmatprep.subr.bf16.mxu0 %v76_v2  ;;  %v94_v26 = vunpack.c.h.s8.bf16 %v62_v24  ;;  %v93_v28 = vunpack.c.h.s8.bf16 %v61_v27  ;;  %v92_v29 = vunpack.c.l.s8.bf16 %v62_v24  ;;  %v91_v31 = vunpack.c.l.s8.bf16 %v61_v27  ;;  %v57_v39 = vld [vmem:[#allocation6 + $0x50] sm:$0xff]  ;;  %v56_v42 = vld [vmem:[#allocation6 + $0x48] sm:$0xff]  ;;  %v55_v45 = vld [vmem:[#allocation6 + $0x40] sm:$0xff]  ;;  %p253_p13 = por %p252_p12, %p251_p11 }
  0x23   :  { %v90_v32 = vunpack.c.h.s8.bf16 %v60_v30  ;;  %v89_v34 = vunpack.c.h.s8.bf16 %v59_v33  ;;  %v88_v35 = vunpack.c.l.s8.bf16 %v60_v30  ;;  %v87_v37 = vunpack.c.l.s8.bf16 %v59_v33  ;;  %v203_v49 = vld [vmem:[#allocation3] ss:$8 sps:$4 sm:$0xff]  }
  0x24   :  { %v86_v38 = vunpack.c.h.s8.bf16 %v58_v36  ;;  %v85_v40 = vunpack.c.h.s8.bf16 %v57_v39  ;;  %v84_v41 = vunpack.c.l.s8.bf16 %v58_v36  ;;  %v83_v43 = vunpack.c.l.s8.bf16 %v57_v39  ;;  %v156_v53 = vld [vmem:[%s328_s3] sm:$0x3]  ;;  %p254_p0 = pnand %p253_p13, %p247_p10 }
  0x25   :  { %110 = vmatpush1.bf16.msra.mxu0 %v75_v6  ;;  %v82_v44 = vunpack.c.h.s8.bf16 %v56_v42  ;;  %v81_v46 = vunpack.c.h.s8.bf16 %v55_v45  ;;  %v80_v47 = vunpack.c.l.s8.bf16 %v56_v42  ;;  %v79_v48 = vunpack.c.l.s8.bf16 %v55_v45 }
  0x26   :  { %111 = vmatprep.subr.bf16.mxu0 %v74_v7  ;;  %v159_v51 = vshrl.u32 %v158_v50, 7 }
  0x28   :  { %v160_v52 = vsub.s32 0, %v159_v51  ;;  %v164_v54 = vsub.s32 1, %v159_v51 }
  0x29   :  { %112 = vmatpush1.bf16.msra.mxu0 %v73_v10 }
  0x2a   :  { %113 = vmatprep.subr.bf16.mxu0 %v72_v11  ;;  %v161_v56 = vrot.slane %v156_v53, %v160_v52  ;;  %v165_v59 = vrot.slane %v156_v53, %v164_v54 }
  0x2d   :  { %114 = vmatpush1.bf16.msra.mxu0 %v71_v13 }
  0x2e   :  { %115 = vmatprep.subr.bf16.mxu0 %v70_v14 }
  0x31   :  { %116 = vmatpush1.bf16.msra.mxu0 %v69_v16 }
  0x32   :  { %117 = vmatprep.subr.bf16.mxu0 %v68_v17 }
  0x35   :  { %118 = vmatpush1.bf16.msra.mxu0 %v67_v19 }
  0x36   :  { %119 = vmatprep.subr.bf16.mxu0 %v66_v20 }
  0x39   :  { %120 = vmatpush1.bf16.msra.mxu0 %v65_v22 }
  0x3a   :  { %121 = vmatprep.subr.bf16.mxu0 %v64_v23 }
  0x3d   :  { %122 = vmatpush1.bf16.msra.mxu0 %v63_v25 }
  0x3e   :  { %123 = vmatprep.subr.bf16.mxu0 %v94_v26 }
  0x41   :  { %124 = vmatpush2.bf16.msra.mxu0 %v93_v28 }
  0x42   :  { %125 = vmatprep.subr.bf16.mxu0 %v92_v29 }
  0x45   :  { %126 = vmatpush2.bf16.msra.mxu0 %v91_v31 }
  0x46   :  { %127 = vmatprep.subr.bf16.mxu0 %v90_v32 }
  0x49   :  { %128 = vmatpush2.bf16.msra.mxu0 %v89_v34 }
  0x4a   :  { %129 = vmatprep.subr.bf16.mxu0 %v88_v35 }
  0x4d   :  { %130 = vmatpush2.bf16.msra.mxu0 %v87_v37 }
  0x4e   :  { %131 = vmatprep.subr.bf16.mxu0 %v86_v38 }
  0x51   :  { %132 = vmatpush2.bf16.msra.mxu0 %v85_v40 }
  0x52   :  { %133 = vmatprep.subr.bf16.mxu0 %v84_v41 }
  0x55   :  { %134 = vmatpush2.bf16.msra.mxu0 %v83_v43 }
  0x56   :  { %135 = vmatprep.subr.bf16.mxu0 %v82_v44 }
  0x59   :  { %136 = vmatpush2.bf16.msra.mxu0 %v81_v46 }
  0x5a   :  { %137 = vmatprep.subr.bf16.mxu0 %v80_v47 }
  0x5d   :  { %138 = vmatpush2.bf16.msra.mxu0 %v79_v48 }
  0x60   :  { %140 = vmatmul.mubr.bf16.vlgmr.msra.gmra.mxu0 %v203_v49 }
 0x120   :  { %v141_v57 = vpop.f32.mrf.mxu0 }
 0x121   :  { %v152_v58 = vmul.f32 %v151_v55, %v141_v57 }
 0x122   :  { %v143_v60 = vpop.f32.mrf.mxu0 }
 0x123   :  { %v168_v61 = vadd.f32 %v161_v56, %v152_v58  ;;  %v153_v62 = vmul.f32 %v151_v55, %v143_v60 }
 0x124   :  { %v145_v63 = vpop.f32.mrf.mxu0 }
 0x125   :  { %172 = vst [vmem:[#allocation8] sm:$0xff] %v168_v61  ;;  %v169_v0 = vadd.f32 %v165_v59, %v153_v62  ;;  %v154_v1 = vmul.f32 %v151_v55, %v145_v63 }
 0x126   :  { %v147_v2 = vpop.f32.mrf.mxu0 }
 0x127   :  { %173 = vst [vmem:[#allocation8 + $0x8] sm:$0xff] %v169_v0  ;;  %v170_v3 = vadd.f32 %v161_v56, %v154_v1  ;;  %v155_v4 = vmul.f32 %v151_v55, %v147_v2 }
 0x129   :  { %174 = vst [vmem:[#allocation8 + $0x10] sm:$0xff] %v170_v3  ;;  %v171_v5 = vadd.f32 %v165_v59, %v155_v4 }
 0x12b   :  { %175 = vst [vmem:[#allocation8 + $0x18] sm:$0xff] %v171_v5 }
 0x12c   :  { %257 = shalt.err (!%p254_p0)
}
 0x12d   :  { %187 = dma.vmem_to_hbm [thread:$0]  %s182_s6, 512, %s329_s4, [#allocation5], %s276_s25, %s276_s25, %s277_s26  }
 0x12e   :  { %270 = dma.done.wait [#allocation5], 512  }
 0x12f   :  { %271 = vsyncadd [#allocation5], 4294966784 }
 0x130   :  { %191 = vsyncpa [#allocation4], 1 }
 0x131   :  { %192 = vsyncpa [#allocation7], 1 }
 0x132   :  { %193 = vsyncpa [#allocation5], 1 }

</bundles_post_ra>
